<compile_context>
chip_gen: v6e
topology: v6e:2x2x1
jax: 0.10.0
libtpu: 0.0.40
codegen_flags: <defaults>
</compile_context>

<pallas_src>
import functools
from typing import NamedTuple

import jax
import jax.numpy as jnp
from jax.experimental import pallas as pl
from jax.experimental.pallas import tpu as pltpu


def _round_up(a: int, b: int) -> int:
    return (a + b - 1) // b * b


def _vmem_capacity_bytes() -> int:
    try:
        return int(pltpu.get_tpu_info().vmem_capacity_bytes)
    except Exception:
        return 64 << 20  # conservative fallback (v7x per-TensorCore VMEM)


def _vmem_estimate(tm, ti, H, lin_b, out_b, use_acc):
    """Rough VMEM footprint of one grid step (double-buffered DMA + temporaries)."""
    weights = 2 * (H * 2 * ti + ti * H) * lin_b   # double-buffered [gate|up] + down tiles
    x_buf = 2 * tm * H * lin_b
    out_buf = 2 * tm * H * out_b
    acc = tm * H * 4 if use_acc else 0
    gu_tmp = tm * 2 * ti * 4                      # f32 fused gate|up matmul result
    act_tmp = tm * ti * (4 + lin_b)               # f32 activation + its linear-dtype cast
    return weights + x_buf + out_buf + acc + gu_tmp + act_tmp


class PackedQwen3MLPWeights(NamedTuple):
    wgu: jax.Array        # (nblk, H, 2*ti)  [gate | up] weight columns, block-major
    wd: jax.Array         # (nblk, ti, H)    down-projection rows, block-major
    hidden: int
    intermediate: int
    ti: int


def pack_qwen3_mlp_weights(w_gate_t, w_up_t, w_down_t, *, ti=None):
    """Pre-pack Qwen3 MLP weights once at load time (hoisted out of the forward path).

    w_gate_t : (H, I) = gate_proj.weight.T   (linear dtype, e.g. bf16)
    w_up_t   : (H, I) = up_proj.weight.T
    w_down_t : (I, H) = down_proj.weight.T
    ti       : intermediate tile; chosen from the physical VMEM budget if None
               (ti=1024 on 128-MiB chips, ti=512 on v7x's 64 MiB).
    """
    H, I = w_gate_t.shape
    assert w_up_t.shape == (H, I) and w_down_t.shape == (I, H)
    lin_b = jnp.dtype(w_gate_t.dtype).itemsize

    if ti is None:
        vmem = _vmem_capacity_bytes()
        ti = 1024 if vmem >= (100 << 20) else 512
        budget = int(vmem * 0.5)                  # double-buffered weight streams only
        while ti > 256 and 2 * 3 * H * ti * lin_b > budget:
            ti //= 2
    ti = max(128, min(ti, _round_up(I, 128)))
    assert ti % 128 == 0

    Ip = _round_up(I, ti)
    nblk = Ip // ti
    if Ip != I:  # zero-padding the I axis is inert: silu(0) * 0 == 0
        w_gate_t = jnp.pad(w_gate_t, ((0, 0), (0, Ip - I)))
        w_up_t = jnp.pad(w_up_t, ((0, 0), (0, Ip - I)))
        w_down_t = jnp.pad(w_down_t, ((0, Ip - I), (0, 0)))

    # Block j = [ gate[:, j*ti:(j+1)*ti] | up[:, j*ti:(j+1)*ti] ], stored block-major so each
    # grid step's weight DMA is one contiguous slab.
    wgu = jnp.concatenate(
        [w_gate_t.reshape(H, nblk, ti), w_up_t.reshape(H, nblk, ti)], axis=2)
    wgu = jnp.transpose(wgu, (1, 0, 2))           # (nblk, H, 2*ti)
    wd = w_down_t.reshape(nblk, ti, H)            # (nblk, ti, H)
    return PackedQwen3MLPWeights(wgu, wd, H, I, ti)


def _qwen3_mlp_kernel(x_ref, wgu_ref, wd_ref, o_ref, *scratch, ti):
    """One (token-tile, I-tile) grid step.

    x_ref   : (tm, H)        linear dtype -- resident across the I axis
    wgu_ref : (1, H, 2*ti)   [gate | up] weight columns for this I block
    wd_ref  : (1, ti, H)     down-projection rows for this I block
    o_ref   : (tm, H)        output (original activation dtype)
    scratch : optional (tm, H) f32 accumulator; omitted when the output is already f32,
              in which case we accumulate directly into the resident output block.
    """
    acc_ref = scratch[0] if scratch else o_ref
    j = pl.program_id(1)

    @pl.when(j == 0)
    def _():
        acc_ref[...] = jnp.zeros_like(acc_ref)

    x = x_ref[...]  # already in the linear (weight) dtype

    # Fused gate+up projection: single MXU matmul -> (tm, 2*ti), f32 accumulation.
    gu = jnp.dot(x, wgu_ref[0], preferred_element_type=jnp.float32)
    gate = gu[:, :ti]
    up = gu[:, ti:]

    # SiLU(gate) * up in f32 (sigmoid -> EUP slot, muls -> VALU; both have slack under an
    # MXU/DMA-bound kernel), then cast to the linear dtype for the down-proj matmul.
    act = (gate * jax.nn.sigmoid(gate) * up).astype(wd_ref.dtype)

    acc_ref[...] += jnp.dot(act, wd_ref[0], preferred_element_type=jnp.float32)

    if scratch:
        @pl.when(j == pl.num_programs(1) - 1)
        def _():
            o_ref[...] = acc_ref[...].astype(o_ref.dtype)


def qwen3_mlp(x, packed: PackedQwen3MLPWeights, *, tm=None):
    """Fused Qwen3 MLP forward on pre-packed weights.

    x  : (T, H) activations in the original dtype.
    tm : token tile. If None, targets the weight-streaming roofline for this chip
         (512 on 128-MiB-VMEM chips, 384 on v7x), shrunk for decode-sized batches and to
         fit the physical VMEM budget.
    """
    orig_dtype = x.dtype
    lin_dtype = packed.wgu.dtype
    lin_b = jnp.dtype(lin_dtype).itemsize
    out_b = jnp.dtype(orig_dtype).itemsize

    T, H = x.shape
    assert H == packed.hidden
    ti = packed.ti
    nblk = packed.wgu.shape[0]
    Ip = nblk * ti

    use_acc = jnp.dtype(orig_dtype) != jnp.dtype(jnp.float32)

    vmem_cap = _vmem_capacity_bytes()
    cap = max(vmem_cap - (2 << 20), 16 << 20)     # physical capacity minus Mosaic headroom

    if tm is None:
        tm = 512 if vmem_cap >= (100 << 20) else 384
    tm = min(tm, _round_up(max(T, 1), 16))        # decode: don't pad tokens beyond need
    tm = max(16, _round_up(tm, 16))
    while tm > 16 and _vmem_estimate(tm, ti, H, lin_b, out_b, use_acc) > cap:
        tm = max(16, _round_up(tm // 2, 16))

    Tp = _round_up(T, tm)

    # Cast once outside the kernel (matches `x.to(linear_dtype)`); pad the token dim.
    x_lin = x.astype(lin_dtype)
    if Tp != T:
        x_lin = jnp.pad(x_lin, ((0, Tp - T), (0, 0)))

    est = _vmem_estimate(tm, ti, H, lin_b, out_b, use_acc)
    vmem_limit = int(min(cap, max(est + (4 << 20), 32 << 20)))

    cost = pl.CostEstimate(
        flops=6 * Tp * H * Ip,                    # 2*T*H*I per projection, 3 projections
        transcendentals=Tp * Ip,                  # sigmoid
        bytes_accessed=(Tp // tm) * 3 * H * Ip * lin_b + Tp * H * (lin_b + out_b),
    )

    scratch_shapes = [pltpu.VMEM((tm, H), jnp.float32)] if use_acc else []

    # TODO(synk): v7x decode (single token tile) leaves the second TensorCore idle; a
    # core-parallel split of the I axis with per-core f32 partial sums + a final combine would
    # roughly double effective weight-streaming bandwidth there.
    out = pl.pallas_call(
        functools.partial(_qwen3_mlp_kernel, ti=ti),
        out_shape=jax.ShapeDtypeStruct((Tp, H), orig_dtype),
        grid=(Tp // tm, nblk),                    # reduction (I) axis last
        in_specs=[
            pl.BlockSpec((tm, H), lambda i, j: (i, 0)),           # x tile (resident over j)
            pl.BlockSpec((1, H, 2 * ti), lambda i, j: (j, 0, 0)),  # contiguous [gate|up] block
            pl.BlockSpec((1, ti, H), lambda i, j: (j, 0, 0)),      # contiguous down-proj block
        ],
        out_specs=pl.BlockSpec((tm, H), lambda i, j: (i, 0)),
        scratch_shapes=scratch_shapes,
        compiler_params=pltpu.CompilerParams(
            dimension_semantics=("parallel", "arbitrary"),
            vmem_limit_bytes=vmem_limit,
        ),
        cost_estimate=cost,
    )(x_lin, packed.wgu, packed.wd)

    return out[:T] if Tp != T else out


if __name__ == "__main__":
    # Small synthetic config: num_tokens=20, hidden=256, intermediate=512.
    T, H, I = 20, 256, 512
    orig_dtype = jnp.float32
    linear_dtype = jnp.bfloat16

    key = jax.random.PRNGKey(0)
    kx, kg, ku, kd = jax.random.split(key, 4)

    x = jax.random.normal(kx, (T, H), dtype=orig_dtype)
    # nn.Linear weights are (out_features, in_features); the packer takes weight.T.
    w_gate = (0.02 * jax.random.normal(kg, (I, H), dtype=jnp.float32)).astype(linear_dtype)
    w_up = (0.02 * jax.random.normal(ku, (I, H), dtype=jnp.float32)).astype(linear_dtype)
    w_down = (0.02 * jax.random.normal(kd, (H, I), dtype=jnp.float32)).astype(linear_dtype)

    # ti=256 -> two reduction steps over I (exercises accumulation);
    # T=20 -> tm shrinks to 32 and exercises token padding.
    packed = pack_qwen3_mlp_weights(w_gate.T, w_up.T, w_down.T, ti=256)
    out = qwen3_mlp(x, packed)
    out = jax.block_until_ready(out)

    # Pure-JAX reference following the same dtype path as the PyTorch module.
    xb = x.astype(linear_dtype)
    gate = jnp.dot(xb, w_gate.T, preferred_element_type=jnp.float32)
    up = jnp.dot(xb, w_up.T, preferred_element_type=jnp.float32)
    act = ((gate * jax.nn.sigmoid(gate)) * up).astype(linear_dtype)
    ref = jnp.dot(act, w_down.T, preferred_element_type=jnp.float32).astype(orig_dtype)

    assert out.shape == (T, H) and out.dtype == orig_dtype
    max_err = float(jnp.max(jnp.abs(out - ref)))
    assert jnp.allclose(out, ref, atol=2e-2, rtol=2e-2), f"max abs err = {max_err}"
    print("KERNEL_OK")
</pallas_src>

<mosaic_0001>
module attributes {stable_mosaic.version = 11 : i64} {
  func.func @_qwen3_mlp_kernel(%arg0: i32, %arg1: i32, %arg2: memref<32x256xbf16, #tpu.memory_space<vmem>>, %arg3: memref<1x256x512xbf16, #tpu.memory_space<vmem>>, %arg4: memref<1x256x256xbf16, #tpu.memory_space<vmem>>, %arg5: memref<32x256xf32, #tpu.memory_space<vmem>>) attributes {dimension_semantics = [#tpu.dimension_semantics<parallel>, #tpu.dimension_semantics<arbitrary>], iteration_bounds = array<i64: 1, 2>, scalar_prefetch = 0 : i64, scratch_operands = 0 : i64, tpu.core_type = #tpu.core_type<tc>, window_params = [{transform_indices = @transform_0, window_bounds = array<i64: 32, 256>}, {transform_indices = @transform_1, window_bounds = array<i64: 1, 256, 512>}, {transform_indices = @transform_2, window_bounds = array<i64: 1, 256, 256>}, {transform_indices = @transform_3, window_bounds = array<i64: 32, 256>}]} {
    %c0_i32 = arith.constant 0 : i32
    %0 = arith.cmpi eq, %arg1, %c0_i32 : i32
    %1 = arith.extui %0 : i1 to i32
    %c0_i32_0 = arith.constant 0 : i32
    %2 = arith.cmpi ne, %1, %c0_i32_0 : i32
    scf.if %2 {
      %cst_14 = arith.constant 0.000000e+00 : f32
      %23 = vector.broadcast %cst_14 : f32 to vector<32x256xf32>
      %c0_15 = arith.constant 0 : index
      %c0_16 = arith.constant 0 : index
      %24 = vector.load %arg5[%c0_15, %c0_16] : memref<32x256xf32, #tpu.memory_space<vmem>>, vector<32x256xf32>
      tpu.vector_store %arg5[%c0_15, %c0_16], %23 {strides = array<i32>} : memref<32x256xf32, #tpu.memory_space<vmem>>, vector<32x256xf32>,
    } else {
    }
    %c0 = arith.constant 0 : index
    %c0_1 = arith.constant 0 : index
    %3 = vector.load %arg2[%c0, %c0_1] : memref<32x256xbf16, #tpu.memory_space<vmem>>, vector<32x256xbf16>
    %c0_2 = arith.constant 0 : index
    %c0_3 = arith.constant 0 : index
    %c0_4 = arith.constant 0 : index
    %4 = vector.load %arg3[%c0_2, %c0_3, %c0_4] : memref<1x256x512xbf16, #tpu.memory_space<vmem>>, vector<1x256x512xbf16>
    %5 = vector.shape_cast %4 : vector<1x256x512xbf16> to vector<256x512xbf16>
    %cst = arith.constant dense<0.000000e+00> : vector<32x512xf32>
    %6 = tpu.matmul %3, %5, %cst {dimension_numbers = #tpu.dot_dimension_numbers<[1], [0], [0], [1], [0, 0, 1, 1], [], []>} : vector<32x256xbf16>, vector<256x512xbf16>, vector<32x512xf32> -> vector<32x512xf32>
    %7 = vector.extract_strided_slice %6 {offsets = [0, 0], sizes = [32, 256], strides = [1, 1]} : vector<32x512xf32> to vector<32x256xf32>
    %8 = vector.extract_strided_slice %6 {offsets = [0, 256], sizes = [32, 256], strides = [1, 1]} : vector<32x512xf32> to vector<32x256xf32>
    %9 = arith.negf %7 : vector<32x256xf32>
    %10 = math.exp %9 : vector<32x256xf32>
    %cst_5 = arith.constant 1.000000e+00 : f32
    %11 = vector.broadcast %cst_5 : f32 to vector<32x256xf32>
    %12 = arith.addf %11, %10 : vector<32x256xf32>
    %13 = arith.divf %11, %12 : vector<32x256xf32>
    %14 = arith.mulf %7, %13 : vector<32x256xf32>
    %15 = arith.mulf %14, %8 : vector<32x256xf32>
    %16 = arith.truncf %15 : vector<32x256xf32> to vector<32x256xbf16>
    %c0_6 = arith.constant 0 : index
    %c0_7 = arith.constant 0 : index
    %17 = vector.load %arg5[%c0_6, %c0_7] : memref<32x256xf32, #tpu.memory_space<vmem>>, vector<32x256xf32>
    %c0_8 = arith.constant 0 : index
    %c0_9 = arith.constant 0 : index
    %c0_10 = arith.constant 0 : index
    %18 = vector.load %arg4[%c0_8, %c0_9, %c0_10] : memref<1x256x256xbf16, #tpu.memory_space<vmem>>, vector<1x256x256xbf16>
    %19 = vector.shape_cast %18 : vector<1x256x256xbf16> to vector<256x256xbf16>
    %cst_11 = arith.constant dense<0.000000e+00> : vector<32x256xf32>
    %20 = tpu.matmul %16, %19, %cst_11 {dimension_numbers = #tpu.dot_dimension_numbers<[1], [0], [0], [1], [0, 0, 1, 1], [], []>} : vector<32x256xbf16>, vector<256x256xbf16>, vector<32x256xf32> -> vector<32x256xf32>
    %21 = arith.addf %17, %20 : vector<32x256xf32>
    %c0_12 = arith.constant 0 : index
    %c0_13 = arith.constant 0 : index
    %22 = vector.load %arg5[%c0_12, %c0_13] : memref<32x256xf32, #tpu.memory_space<vmem>>, vector<32x256xf32>
    tpu.vector_store %arg5[%c0_12, %c0_13], %21 {strides = array<i32>} : memref<32x256xf32, #tpu.memory_space<vmem>>, vector<32x256xf32>,
    return
  }
  func.func @transform_0(%arg0: i32, %arg1: i32) -> (i32, i32) {
    %c0_i32 = arith.constant 0 : i32
    %c0_i32_0 = arith.constant 0 : i32
    return %arg0, %c0_i32 : i32, i32
  }
  func.func @transform_1(%arg0: i32, %arg1: i32) -> (i32, i32, i32) {
    %c0_i32 = arith.constant 0 : i32
    %c0_i32_0 = arith.constant 0 : i32
    %c0_i32_1 = arith.constant 0 : i32
    return %arg1, %c0_i32, %c0_i32_0 : i32, i32, i32
  }
  func.func @transform_2(%arg0: i32, %arg1: i32) -> (i32, i32, i32) {
    %c0_i32 = arith.constant 0 : i32
    %c0_i32_0 = arith.constant 0 : i32
    %c0_i32_1 = arith.constant 0 : i32
    return %arg1, %c0_i32, %c0_i32_0 : i32, i32, i32
  }
  func.func @transform_3(%arg0: i32, %arg1: i32) -> (i32, i32) {
    %c0_i32 = arith.constant 0 : i32
    %c0_i32_0 = arith.constant 0 : i32
    return %arg0, %c0_i32 : i32, i32
  }
}

</mosaic_0001>

<bundles_post_ra>
// kernel: tpu_custom_call.1
= control target key start
LH: loop header
LB: loop body
LE: loop exit
PB: predicated region body
PF: predicated region fallthrough
CT: control target
= control target key end

     0   :  { %8 = vsyncpa [#allocation3], 0  ;;  %s2113_s0 = inlined_call_operand.hbm [shape: bf16[32,256], index: 0, kind: input, shape index: {}]   ;;  %s2114_s1 = inlined_call_operand.hbm [shape: bf16[2,256,512], index: 1, kind: input, shape index: {}]   ;;  %s2115_s2 = inlined_call_operand.hbm [shape: bf16[2,256,256], index: 2, kind: input, shape index: {}]   ;;  %s2116_s3 = inlined_call_operand.hbm [shape: f32[32,256], index: 3, kind: output, shape index: {}]  }
   0x1   :  { %9 = vsyncpa [#allocation6], 0 }
   0x2   :  { %11 = vsyncpa [#allocation6 + $0x1], 0 }
   0x3   :  { %12 = vsyncpa [#allocation4], 0  ;;  %s1853_s12 = smov 0   ;;  %s1855_s13 = smov 0  }
   0x4   :  { %s1857_s14 = smov 0   ;;  %s1859_s15 = smov 0  }
   0x5   :  { %s1861_s16 = smov 0   ;;  %s1863_s17 = smov 0  }
   0x6 LB: > { %s27_s18 = sadd.s32 1, %s1816_s16  ;;  %s63_s19 = sadd.s32 1, %s1808_s14  ;;  %s1820_s17 = sphi %s1863_s17, %s18_s17   ;;  %s1816_s16 = sphi %s1861_s16, %s2125_s16   ;;  %s1812_s15 = sphi %s1859_s15, %s2124_s15   ;;  %s1808_s14 = sphi %s1857_s14, %s2123_s14   ;;  %s1804_s13 = sphi %s1855_s13, %s2122_s13   ;;  %s1800_s12 = sphi %s1853_s12, %s2121_s12  }
   0x7   : > { %p28_p0 = scmp.ge.s32.totalorder %s27_s18, 2  ;;  %p70_p1 = scmp.ne.s32.totalorder %s1808_s14, %s1804_s13 }
   0x8   : > { %p71_p2 = scmp.eq.s32.totalorder %s1820_s17, 0  ;;  %p1413_p4 = scmp.lt.s32.totalorder %s1820_s17, 2 }
   0x9   : > { %s2127_s18 = smov (%p28_p0, %s27_s18), 0  ;;  %s169_s21 = sand.u32 1, %s1820_s17  }
   0xa   : > { %p72_p3 = por %p71_p2, %p70_p1  ;;  %s60_s20 = ssub.s32 %s1816_s16, %s2127_s18 }
   0xb   : > { %p61_p5 = scmp.eq.s32.totalorder %s60_s20, 0  ;;  %s171_s22 = sand.u32 1, %s1808_s14  }
   0xc   : > { %s1355_s23 = sshll.u32 %s1816_s16, 13  ;;  %s1232_s25 = sshll.u32 %s171_s22, 9 }
   0xd   : > { %s1897_s24 = scalar_select %p61_p5, %s1808_s14, %s63_s19  }
   0xe   : > { %s179_s28 = scalar_lea.hbm %s2114_s1, %s1355_s23  ;;  %p1902_p6 = pnand %p1413_p4, %p72_p3 }
   0xf   : > { %s173_s30 = scalar_lea.vmem [#allocation5], %s1232_s25  ;;  %s1235_s5 = sshll.u32 %s171_s22, 8 }
  0x10   : > { %s180_s4 = sshll.u32 %s173_s30, 4  ;;  %s1906_s6 = scalar_lea.sflag [#allocation6], %s169_s21  ;;  %s181_s4 = int_to_ptr.vmem [resolvable:$true] %s180_s4 }
  0x11   : > { %p1658_p7 = pneg %p1902_p6  ;;  %s1669_s7 = scalar_lea.vmem %s181_s4, 8192 }
  0x12   : > { %p1670_p8 = scmp.ne.s32.totalorder %s181_s4, %s1669_s7  ;;  %s1822_s8 = smov [#allocation5]  }
  0x13   : > { %s1674_s9 = sshll.u32 %s1822_s8, 4  ;;  %s1675_s9 = int_to_ptr.vmem [resolvable:$false] %s1674_s9 }
  0x14   : > { %p1672_p9 = pnand %p1670_p8, %p1658_p7  ;;  %s1676_s10 = scalar_lea.vmem %s1675_s9, 16384 }
  0x15   : > { %p1677_p11 = scmp.lt.s32.totalorder %s181_s4, %s1675_s9  ;;  %p1678_p12 = scmp.lt.s32.totalorder %s1676_s10, %s1669_s7 }
  0x16   : > { %p1673_p10 = pneg %p1672_p9 }
  0x17   : > { %p1679_p13 = por %p1678_p12, %p1677_p11 }
  0x19   : > { %p1680_p0 = pnand %p1679_p13, %p1673_p10 }
  0x1b   : > { %1683 = shalt.err (!%p1680_p0)
}
  0x1c   : > { %s1823_s11 = smov 256   ;;  %s1824_s19 = smov 16  }
  0x1d   : > { %1408 = dma.hbm_to_vmem [thread:$0]  (!%p1902_p6), %s179_s28, 8192, %s181_s4, %s1906_s6, %s1823_s11, %s1823_s11, %s1824_s19  }
  0x1e   : > { %s194_s20 = scalar_lea.vmem [#allocation7], %s1235_s5  ;;  %s1917_s22 = sadd.s32 4294967295, %s1820_s17  }
  0x1f   : > { %s201_s21 = sshll.u32 %s194_s20, 4  ;;  %p76_p1 = scmp.ne.s32.totalorder %s1804_s13, %s1800_s12  ;;  %s202_s21 = int_to_ptr.vmem [resolvable:$true] %s201_s21 }
  0x20   : > { %p77_p2 = scmp.eq.s32.totalorder %s1917_s22, 0  ;;  %p1229_p3 = scmp.ge.s32.totalorder %s1820_s17, 1 }
  0x21   : > { %p139_p4 = scmp.lt.s32.totalorder %s1820_s17, 3  ;;  %s1825_s26 = smov [#allocation2]  }
  0x22   : > { %p1926_p5 = por %p77_p2, %p76_p1  ;;  %s155_s27 = sshll.u32 %s1825_s26, 4  ;;  %s1934_s27 = int_to_ptr.vmem [resolvable:$true] %s155_s27 }
  0x23   : > { %p1930_p8 = pnand %p1229_p3, %p139_p4  ;;  %s1356_s12 = sshll.u32 %s1816_s16, 12 }
  0x24   : > { %s200_s5 = scalar_lea.hbm %s2115_s2, %s1356_s12  ;;  %s1697_s7 = scalar_lea.vmem %s202_s21, 4096 }
  0x25   : > { %p1401_p9 = pneg %p1930_p8  ;;  %p1698_p11 = scmp.ne.s32.totalorder %s202_s21, %s1697_s7 }
  0x26   : > { %s1826_s8 = smov [#allocation7]  }
  0x27   : > { %p1941_p10 = pnand %p1401_p9, %p77_p2  ;;  %p1700_p12 = pnand %p1698_p11, %p1658_p7 }
  0x28   : > { %s1702_s9 = sshll.u32 %s1826_s8, 4  ;;  %s1703_s9 = int_to_ptr.vmem [resolvable:$false] %s1702_s9 }
  0x29   : > { %p1701_p13 = pneg %p1700_p12  ;;  %s1704_s10 = scalar_lea.vmem %s1703_s9, 8192 }
  0x2a   : > { %p1705_p0 = scmp.lt.s32.totalorder %s202_s21, %s1703_s9  ;;  %p1706_p1 = scmp.lt.s32.totalorder %s1704_s10, %s1697_s7 }
  0x2c   : > { %p1707_p3 = por %p1706_p1, %p1705_p0 }
  0x2e   : > { %p1708_p4 = pnand %p1707_p3, %p1701_p13 }
  0x30   : > { %1711 = shalt.err (!%p1708_p4)
}
  0x31   : > { %s1827_s11 = smov 128   ;;  %s1828_s19 = smov 8  }
  0x32   : > { %1411 = dma.hbm_to_vmem [thread:$0]  (!%p1902_p6), %s200_s5, 4096, %s202_s21, %s1906_s6, %s1827_s11, %s1827_s11, %s1828_s19  }
  0x33   : > { %p1714_p7 = pneg %p1941_p10  ;;  %s1723_s20 = scalar_lea.vmem %s1934_s27, 512 }
  0x34   : > { %p1724_p9 = scmp.ne.s32.totalorder %s1934_s27, %s1723_s20  ;;  %p1731_p0 = scmp.lt.s32.totalorder %s1934_s27, %s1934_s27 }
  0x35   : > { %p1732_p13 = scmp.lt.s32.totalorder %s1723_s20, %s1723_s20 }
  0x36   : > { %p1726_p11 = pnand %p1724_p9, %p1714_p7 }
  0x37   : > { %p1733_p1 = por %p1732_p13, %p1731_p0 }
  0x38   : > { %p1727_p12 = pneg %p1726_p11 }
  0x3a   : > { %p1734_p3 = pnand %p1733_p1, %p1727_p12 }
  0x3c   : > { %1737 = shalt.err (!%p1734_p3)
}
  0x3d   : > { %1404 = dma.hbm_to_vmem [thread:$0]  (!%p1941_p10), %s2113_s0, 512, %s1934_s27, [#allocation3], %s1827_s11, %s1827_s11, %s1828_s19  }
  0x3e   : > { %213 = sbr.rel (%p1930_p8) target bundleno = 602 (0x25a), region = 32 }
  0x43   : > { %1787 = dma.done.wait (%p77_p2), [#allocation3], 512  }
  0x44   : > { %1789 = vsyncadd (%p77_p2), [#allocation3], 4294966784  ;;  %s219_s29 = sand.u32 1, %s1917_s22   ;;  %s221_s6 = sand.u32 1, %s1804_s13  }
  0x45   : > { %s1240_s21 = sshll.u32 %s221_s6, 9  ;;  %s220_s28 = scalar_lea.sflag [#allocation6], %s219_s29 }
  0x46   : > { %s1974_s30 = scalar_lea.vmem [#allocation5], %s1240_s21 }
  0x47   : > { %1791 = dma.done.wait (%p1926_p5), %s220_s28, 12288  }
  0x48   : > { %1793 = vsyncadd (%p1926_p5), %s220_s28, 4294955008  ;;  %s1241_s25 = sshll.u32 %s221_s6, 8  ;;  %p1242_p6 = scmp.ne.s32.totalorder %s1812_s15, 0 }
  0x49   : > { %s1980_s27 = scalar_lea.vmem [#allocation7], %s1241_s25 }
  0x4a   : > { %260 = sbr.rel (%p1242_p6) target bundleno = 84 (0x54), region = 48 }
  0x4f   : > { %v1829_v0 = vmov 0.0  }
  0x50   : > { %261 = vst [vmem:[#allocation8] sm:$0xff] %v1829_v0  ;;  %262 = vst [vmem:[#allocation8 + $0x8] sm:$0xff] %v1829_v0 }
  0x51   : > { %263 = vst [vmem:[#allocation8 + $0x10] sm:$0xff] %v1829_v0  ;;  %264 = vst [vmem:[#allocation8 + $0x18] sm:$0xff] %v1829_v0 }
  0x52   : > { %265 = vst [vmem:[#allocation8 + $0x20] sm:$0xff] %v1829_v0  ;;  %266 = vst [vmem:[#allocation8 + $0x28] sm:$0xff] %v1829_v0 }
  0x53   : > { %267 = vst [vmem:[#allocation8 + $0x30] sm:$0xff] %v1829_v0  ;;  %268 = vst [vmem:[#allocation8 + $0x38] sm:$0xff] %v1829_v0 }
  0x54 PF: > { %v1474_v1 = vld [vmem:[%s1974_s30 + $0xe4] ss:$16 sps:$4 sm:$0xff]   ;;  %v1476_v2 = vld [vmem:[%s1974_s30 + $0xe0] ss:$16 sps:$4 sm:$0xff]   ;;  %v1497_v9 = vld [vmem:[%s1974_s30 + $0xec] ss:$16 sps:$4 sm:$0xff]  }
  0x55   : > { %677 = vmatprep.subr.bf16.mxu0 %v1474_v1  ;;  %v1477_v3 = vld [vmem:[%s1974_s30 + $0xc4] ss:$16 sps:$4 sm:$0xff]   ;;  %v1479_v4 = vld [vmem:[%s1974_s30 + $0xc0] ss:$16 sps:$4 sm:$0xff]   ;;  %v1500_v10 = vld [vmem:[%s1974_s30 + $0xe8] ss:$16 sps:$4 sm:$0xff]   ;;  %730 = vmatprep.subr.bf16.mxu1 %v1497_v9 }
  0x56   : > { %678 = vmatpush1.bf16.msra.mxu0 %v1476_v2  ;;  %v1480_v5 = vld [vmem:[%s1974_s30 + $0xa4] ss:$16 sps:$4 sm:$0xff]   ;;  %v1482_v6 = vld [vmem:[%s1974_s30 + $0xa0] ss:$16 sps:$4 sm:$0xff]   ;;  %v1503_v12 = vld [vmem:[%s1974_s30 + $0xcc] ss:$16 sps:$4 sm:$0xff]   ;;  %731 = vmatpush1.bf16.msra.mxu1 %v1500_v10 }
  0x57   : > { %679 = vmatprep.subr.bf16.mxu0 %v1477_v3  ;;  %v1483_v7 = vld [vmem:[%s1974_s30 + $0x84] ss:$16 sps:$4 sm:$0xff]   ;;  %v1485_v8 = vld [vmem:[%s1974_s30 + $0x80] ss:$16 sps:$4 sm:$0xff]   ;;  %v1506_v13 = vld [vmem:[%s1974_s30 + $0xc8] ss:$16 sps:$4 sm:$0xff]   ;;  %732 = vmatprep.subr.bf16.mxu1 %v1503_v12 }
  0x58   : > { %v1486_v11 = vld [vmem:[%s1974_s30 + $0x64] ss:$16 sps:$4 sm:$0xff]   ;;  %v1488_v14 = vld [vmem:[%s1974_s30 + $0x60] ss:$16 sps:$4 sm:$0xff]   ;;  %v1509_v16 = vld [vmem:[%s1974_s30 + $0xac] ss:$16 sps:$4 sm:$0xff]  }
  0x59   : > { %v1489_v15 = vld [vmem:[%s1974_s30 + $0x44] ss:$16 sps:$4 sm:$0xff]   ;;  %v1512_v17 = vld [vmem:[%s1974_s30 + $0xa8] ss:$16 sps:$4 sm:$0xff]   ;;  %v1491_v18 = vld [vmem:[%s1974_s30 + $0x40] ss:$16 sps:$4 sm:$0xff]  }
  0x5a   : > { %680 = vmatpush1.bf16.msra.mxu0 %v1479_v4  ;;  %733 = vmatpush1.bf16.msra.mxu1 %v1506_v13  ;;  %v1515_v19 = vld [vmem:[%s1974_s30 + $0x8c] ss:$16 sps:$4 sm:$0xff]   ;;  %v1492_v20 = vld [vmem:[%s1974_s30 + $0x24] ss:$16 sps:$4 sm:$0xff]   ;;  %v1494_v21 = vld [vmem:[%s1974_s30 + $0x20] ss:$16 sps:$4 sm:$0xff]  }
  0x5b   : > { %681 = vmatprep.subr.bf16.mxu0 %v1480_v5  ;;  %734 = vmatprep.subr.bf16.mxu1 %v1509_v16  ;;  %v1518_v22 = vld [vmem:[%s1974_s30 + $0x88] ss:$16 sps:$4 sm:$0xff]   ;;  %v1521_v23 = vld [vmem:[%s1974_s30 + $0x6c] ss:$16 sps:$4 sm:$0xff]   ;;  %v1495_v24 = vld [vmem:[%s1974_s30 + $0x4] ss:$16 sps:$4 sm:$0xff]  }
  0x5c   : > { %v1524_v25 = vld [vmem:[%s1974_s30 + $0x68] ss:$16 sps:$4 sm:$0xff]   ;;  %v1499_v26 = vld [vmem:[%s1974_s30] ss:$16 sps:$4 sm:$0xff]   ;;  %v1527_v27 = vld [vmem:[%s1974_s30 + $0x4c] ss:$16 sps:$4 sm:$0xff]  }
  0x5d   : > { %v1501_v28 = vld [vmem:[%s1974_s30 + $0x1e4] ss:$16 sps:$4 sm:$0xff]   ;;  %v1505_v29 = vld [vmem:[%s1974_s30 + $0x1e0] ss:$16 sps:$4 sm:$0xff]   ;;  %v1530_v30 = vld [vmem:[%s1974_s30 + $0x48] ss:$16 sps:$4 sm:$0xff]  }
  0x5e   : > { %682 = vmatpush1.bf16.msra.mxu0 %v1482_v6  ;;  %735 = vmatpush1.bf16.msra.mxu1 %v1512_v17  ;;  %v1533_v31 = vld [vmem:[%s1974_s30 + $0x2c] ss:$16 sps:$4 sm:$0xff]   ;;  %v1507_v32 = vld [vmem:[%s1974_s30 + $0x1c4] ss:$16 sps:$4 sm:$0xff]   ;;  %v1536_v33 = vld [vmem:[%s1974_s30 + $0x28] ss:$16 sps:$4 sm:$0xff]  }
  0x5f   : > { %683 = vmatprep.subr.bf16.mxu0 %v1483_v7  ;;  %736 = vmatprep.subr.bf16.mxu1 %v1515_v19  ;;  %v1551_v34 = vld [vmem:[#allocation2 + $0x4] ss:$8 sps:$4 sm:$0xff]   ;;  %v1511_v35 = vld [vmem:[%s1974_s30 + $0x1c0] ss:$16 sps:$4 sm:$0xff]   ;;  %v1542_v38 = vld [vmem:[%s1974_s30 + $0x8] ss:$16 sps:$4 sm:$0xff]  }
  0x60   : > { %v1539_v36 = vld [vmem:[%s1974_s30 + $0xc] ss:$16 sps:$4 sm:$0xff]   ;;  %v1513_v37 = vld [vmem:[%s1974_s30 + $0x1a4] ss:$16 sps:$4 sm:$0xff]   ;;  %709 = vmatprep.mubr.bf16.mxu0 %v1551_v34  ;;  %762 = vmatprep.mubr.bf16.mxu1 %v1551_v34  ;;  %v1517_v39 = vld [vmem:[%s1974_s30 + $0x1a0] ss:$16 sps:$4 sm:$0xff]  }
  0x61   : > { %v1545_v40 = vld [vmem:[%s1974_s30 + $0x1ec] ss:$16 sps:$4 sm:$0xff]   ;;  %v1519_v41 = vld [vmem:[%s1974_s30 + $0x184] ss:$16 sps:$4 sm:$0xff]   ;;  %v1548_v42 = vld [vmem:[%s1974_s30 + $0x1e8] ss:$16 sps:$4 sm:$0xff]  }
  0x62   : > { %684 = vmatpush1.bf16.msra.mxu0 %v1485_v8  ;;  %737 = vmatpush1.bf16.msra.mxu1 %v1518_v22  ;;  %v1523_v43 = vld [vmem:[%s1974_s30 + $0x180] ss:$16 sps:$4 sm:$0xff]   ;;  %v1552_v44 = vld [vmem:[%s1974_s30 + $0x1cc] ss:$16 sps:$4 sm:$0xff]   ;;  %v1525_v45 = vld [vmem:[%s1974_s30 + $0x164] ss:$16 sps:$4 sm:$0xff]  }
  0x63   : > { %685 = vmatprep.subr.bf16.mxu0 %v1486_v11  ;;  %738 = vmatprep.subr.bf16.mxu1 %v1521_v23  ;;  %v1554_v46 = vld [vmem:[%s1974_s30 + $0x1c8] ss:$16 sps:$4 sm:$0xff]   ;;  %v1529_v47 = vld [vmem:[%s1974_s30 + $0x160] ss:$16 sps:$4 sm:$0xff]   ;;  %v1555_v48 = vld [vmem:[%s1974_s30 + $0x1ac] ss:$16 sps:$4 sm:$0xff]  }
  0x64   : > { %v1531_v49 = vld [vmem:[%s1974_s30 + $0x144] ss:$16 sps:$4 sm:$0xff]   ;;  %v1535_v50 = vld [vmem:[%s1974_s30 + $0x140] ss:$16 sps:$4 sm:$0xff]   ;;  %v1557_v51 = vld [vmem:[%s1974_s30 + $0x1a8] ss:$16 sps:$4 sm:$0xff]  }
  0x65   : > { %v1537_v52 = vld [vmem:[%s1974_s30 + $0x124] ss:$16 sps:$4 sm:$0xff]   ;;  %v1561_v53 = vld [vmem:[%s1974_s30 + $0x18c] ss:$16 sps:$4 sm:$0xff]   ;;  %v1563_v54 = vld [vmem:[%s1974_s30 + $0x188] ss:$16 sps:$4 sm:$0xff]  }
  0x66   : > { %686 = vmatpush1.bf16.msra.mxu0 %v1488_v14  ;;  %739 = vmatpush1.bf16.msra.mxu1 %v1524_v25  ;;  %v1541_v55 = vld [vmem:[%s1974_s30 + $0x120] ss:$16 sps:$4 sm:$0xff]   ;;  %v1564_v56 = vld [vmem:[%s1974_s30 + $0x16c] ss:$16 sps:$4 sm:$0xff]   ;;  %v1543_v57 = vld [vmem:[%s1974_s30 + $0x104] ss:$16 sps:$4 sm:$0xff]  }
  0x67   : > { %687 = vmatprep.subr.bf16.mxu0 %v1489_v15  ;;  %740 = vmatprep.subr.bf16.mxu1 %v1527_v27  ;;  %v1566_v58 = vld [vmem:[%s1974_s30 + $0x168] ss:$16 sps:$4 sm:$0xff]   ;;  %v1547_v59 = vld [vmem:[%s1974_s30 + $0x100] ss:$16 sps:$4 sm:$0xff]   ;;  %v1567_v60 = vld [vmem:[%s1974_s30 + $0x14c] ss:$16 sps:$4 sm:$0xff]  }
  0x68   : > { %v1578_v61 = vld [vmem:[%s1980_s27 + $0x74] ss:$8 sps:$4 sm:$0xff]   ;;  %v1549_v62 = vld [vmem:[#allocation2] ss:$8 sps:$4 sm:$0xff]   ;;  %v1576_v2 = vld [vmem:[%s1980_s27 + $0x70] ss:$8 sps:$4 sm:$0xff]  }
  0x69   : > { %v1569_v63 = vld [vmem:[%s1974_s30 + $0x148] ss:$16 sps:$4 sm:$0xff]   ;;  %v1558_v0 = vld [vmem:[#allocation2 + $0x14] ss:$8 sps:$4 sm:$0xff]   ;;  %v1581_v3 = vld [vmem:[%s1980_s27 + $0x64] ss:$8 sps:$4 sm:$0xff]  }
  0x6a   : > { %688 = vmatpush1.bf16.msra.mxu0 %v1491_v18  ;;  %741 = vmatpush1.bf16.msra.mxu1 %v1530_v30  ;;  %v1570_v1 = vld [vmem:[%s1974_s30 + $0x12c] ss:$16 sps:$4 sm:$0xff]   ;;  %v1572_v4 = vld [vmem:[%s1974_s30 + $0x128] ss:$16 sps:$4 sm:$0xff]   ;;  %s1830_s15 = smov [#allocation8]   ;;  %p1415_p2 = scmp.eq.s32.totalorder %s1917_s22, 1 }
  0x6b   : > { %689 = vmatprep.subr.bf16.mxu0 %v1492_v20  ;;  %742 = vmatprep.subr.bf16.mxu1 %v1533_v31  ;;  %v1573_v5 = vld [vmem:[%s1974_s30 + $0x10c] ss:$16 sps:$4 sm:$0xff]   ;;  %v1579_v6 = vld [vmem:[%s1980_s27 + $0x60] ss:$8 sps:$4 sm:$0xff]   ;;  %v1560_v8 = vld [vmem:[#allocation2 + $0x10] ss:$8 sps:$4 sm:$0xff]  }
  0x6c   : > { %v1584_v7 = vld [vmem:[%s1980_s27 + $0x54] ss:$8 sps:$4 sm:$0xff]   ;;  %v1575_v9 = vld [vmem:[%s1974_s30 + $0x108] ss:$16 sps:$4 sm:$0xff]   ;;  %v1587_v11 = vld [vmem:[%s1980_s27 + $0x44] ss:$8 sps:$4 sm:$0xff]  }
  0x6d   : > { %v1582_v10 = vld [vmem:[%s1980_s27 + $0x50] ss:$8 sps:$4 sm:$0xff]   ;;  %v1585_v12 = vld [vmem:[%s1980_s27 + $0x40] ss:$8 sps:$4 sm:$0xff]   ;;  %v1590_v13 = vld [vmem:[%s1980_s27 + $0x34] ss:$8 sps:$4 sm:$0xff]  }
  0x6e   : > { %690 = vmatpush1.bf16.msra.mxu0 %v1494_v21  ;;  %743 = vmatpush1.bf16.msra.mxu1 %v1536_v33  ;;  %v1588_v14 = vld [vmem:[%s1980_s27 + $0x30] ss:$8 sps:$4 sm:$0xff]   ;;  %v1593_v15 = vld [vmem:[%s1980_s27 + $0x24] ss:$8 sps:$4 sm:$0xff]   ;;  %v1591_v16 = vld [vmem:[%s1980_s27 + $0x20] ss:$8 sps:$4 sm:$0xff]  }
  0x6f   : > { %691 = vmatprep.subr.bf16.mxu0 %v1495_v24  ;;  %744 = vmatprep.subr.bf16.mxu1 %v1539_v36  ;;  %v1596_v17 = vld [vmem:[%s1980_s27 + $0x14] ss:$8 sps:$4 sm:$0xff]   ;;  %v1594_v18 = vld [vmem:[%s1980_s27 + $0x10] ss:$8 sps:$4 sm:$0xff]   ;;  %v1599_v19 = vld [vmem:[%s1980_s27 + $0x4] ss:$8 sps:$4 sm:$0xff]  }
  0x70   : > { %v1597_v20 = vld [vmem:[%s1980_s27] ss:$8 sps:$4 sm:$0xff]   ;;  %v1602_v21 = vld [vmem:[%s1980_s27 + $0xf4] ss:$8 sps:$4 sm:$0xff]   ;;  %v1600_v22 = vld [vmem:[%s1980_s27 + $0xf0] ss:$8 sps:$4 sm:$0xff]  }
  0x71   : > { %v1605_v23 = vld [vmem:[%s1980_s27 + $0xe4] ss:$8 sps:$4 sm:$0xff]   ;;  %v1603_v24 = vld [vmem:[%s1980_s27 + $0xe0] ss:$8 sps:$4 sm:$0xff]   ;;  %v1608_v25 = vld [vmem:[%s1980_s27 + $0xd4] ss:$8 sps:$4 sm:$0xff]  }
  0x72   : > { %692 = vmatpush1.bf16.msra.mxu0 %v1499_v26  ;;  %745 = vmatpush1.bf16.msra.mxu1 %v1542_v38  ;;  %v1606_v26 = vld [vmem:[%s1980_s27 + $0xd0] ss:$8 sps:$4 sm:$0xff]   ;;  %v1611_v27 = vld [vmem:[%s1980_s27 + $0xc4] ss:$8 sps:$4 sm:$0xff]   ;;  %v1620_v33 = vld [vmem:[%s1980_s27 + $0x94] ss:$8 sps:$4 sm:$0xff]  }
  0x73   : > { %693 = vmatprep.subr.bf16.mxu0 %v1501_v28  ;;  %746 = vmatprep.subr.bf16.mxu1 %v1545_v40  ;;  %v1609_v28 = vld [vmem:[%s1980_s27 + $0xc0] ss:$8 sps:$4 sm:$0xff]   ;;  %v1612_v30 = vld [vmem:[%s1980_s27 + $0xb0] ss:$8 sps:$4 sm:$0xff]   ;;  %v1617_v31 = vld [vmem:[%s1980_s27 + $0xa4] ss:$8 sps:$4 sm:$0xff]  }
  0x74   : > { %v1618_v34 = vld [vmem:[%s1980_s27 + $0x90] ss:$8 sps:$4 sm:$0xff]   ;;  %v1621_v36 = vld [vmem:[%s1980_s27 + $0x80] ss:$8 sps:$4 sm:$0xff]   ;;  %s1130_s23 = sshll.u32 %s1830_s15, 4  ;;  %s1131_s23 = int_to_ptr.vmem [resolvable:$true] %s1130_s23 }
  0x75   : > { %s1738_s4 = scalar_lea.vmem %s1131_s23, 1024  ;;  %p1745_p4 = scmp.lt.s32.totalorder %s1131_s23, %s1131_s23 }
  0x76   : > { %694 = vmatpush2.bf16.msra.mxu0 %v1505_v29  ;;  %747 = vmatpush2.bf16.msra.mxu1 %v1548_v42  ;;  %v1614_v29 = vld [vmem:[%s1980_s27 + $0xb4] ss:$8 sps:$4 sm:$0xff]   ;;  %p1739_p5 = scmp.ne.s32.totalorder %s1131_s23, %s1738_s4  ;;  %p1746_p7 = scmp.lt.s32.totalorder %s1738_s4, %s1738_s4 }
  0x77   : > { %695 = vmatprep.subr.bf16.mxu0 %v1507_v32  ;;  %748 = vmatprep.subr.bf16.mxu1 %v1552_v44  ;;  %v1615_v32 = vld [vmem:[%s1980_s27 + $0xa0] ss:$8 sps:$4 sm:$0xff]  }
  0x78   : > { %p1740_p8 = pnand %p1739_p5, %p1415_p2  ;;  %p1747_p9 = por %p1746_p7, %p1745_p4 }
  0x7a   : > { %696 = vmatpush2.bf16.msra.mxu0 %v1511_v35  ;;  %749 = vmatpush2.bf16.msra.mxu1 %v1554_v46  ;;  %v1623_v35 = vld [vmem:[%s1980_s27 + $0x84] ss:$8 sps:$4 sm:$0xff]   ;;  %p1741_p10 = pneg %p1740_p8 }
  0x7b   : > { %697 = vmatprep.subr.bf16.mxu0 %v1513_v37  ;;  %750 = vmatprep.subr.bf16.mxu1 %v1555_v48 }
  0x7c   : > { %p1748_p11 = pnand %p1747_p9, %p1741_p10 }
  0x7e   : > { %698 = vmatpush2.bf16.msra.mxu0 %v1517_v39  ;;  %751 = vmatpush2.bf16.msra.mxu1 %v1557_v51 }
  0x7f   : > { %699 = vmatprep.subr.bf16.mxu0 %v1519_v41  ;;  %752 = vmatprep.subr.bf16.mxu1 %v1561_v53 }
  0x82   : > { %700 = vmatpush2.bf16.msra.mxu0 %v1523_v43  ;;  %753 = vmatpush2.bf16.msra.mxu1 %v1563_v54 }
  0x83   : > { %701 = vmatprep.subr.bf16.mxu0 %v1525_v45  ;;  %754 = vmatprep.subr.bf16.mxu1 %v1564_v56 }
  0x86   : > { %702 = vmatpush2.bf16.msra.mxu0 %v1529_v47  ;;  %755 = vmatpush2.bf16.msra.mxu1 %v1566_v58 }
  0x87   : > { %703 = vmatprep.subr.bf16.mxu0 %v1531_v49  ;;  %756 = vmatprep.subr.bf16.mxu1 %v1567_v60 }
  0x8a   : > { %704 = vmatpush2.bf16.msra.mxu0 %v1535_v50  ;;  %757 = vmatpush2.bf16.msra.mxu1 %v1569_v63 }
  0x8b   : > { %705 = vmatprep.subr.bf16.mxu0 %v1537_v52  ;;  %758 = vmatprep.subr.bf16.mxu1 %v1570_v1 }
  0x8e   : > { %706 = vmatpush2.bf16.msra.mxu0 %v1541_v55  ;;  %759 = vmatpush2.bf16.msra.mxu1 %v1572_v4 }
  0x8f   : > { %707 = vmatprep.subr.bf16.mxu0 %v1543_v57  ;;  %760 = vmatprep.subr.bf16.mxu1 %v1573_v5 }
  0x92   : > { %708 = vmatpush2.bf16.msra.mxu0 %v1547_v59  ;;  %761 = vmatpush2.bf16.msra.mxu1 %v1575_v9 }
  0x93   : > { %1051 = vmatprep.subr.bf16.mxu0 %v1578_v61  ;;  %1357 = vmatprep.subr.bf16.mxu1 %v1578_v61 }
  0x95   : > { %710 = vmatmul.mubr.bf16.vlgmr.msra.gmra.mxu0 %v1549_v62  ;;  %763 = vmatmul.mubr.bf16.vlgmr.msra.gmra.mxu1 %v1549_v62 }
  0x96   : > { %719 = vmatprep.mubr.bf16.mxu0 %v1558_v0  ;;  %1052 = vmatpush1.bf16.msra.mxu0 %v1576_v2 }
  0x97   : > { %1053 = vmatprep.subr.bf16.mxu0 %v1581_v3  ;;  %772 = vmatprep.mubr.bf16.mxu1 %v1558_v0 }
  0x98   : > { %1373 = vmatpush1.bf16.msra.mxu1 %v1576_v2 }
  0x99   : > { %1358 = vmatprep.subr.bf16.mxu1 %v1581_v3 }
  0x9a   : > { %1054 = vmatpush1.bf16.msra.mxu0 %v1579_v6 }
  0x9b   : > { %1055 = vmatprep.subr.bf16.mxu0 %v1584_v7 }
  0x9c   : > { %1374 = vmatpush1.bf16.msra.mxu1 %v1579_v6 }
  0x9d   : > { %720 = vmatmul.mubr.bf16.gmra.mxu0 %v1560_v8  ;;  %1359 = vmatprep.subr.bf16.mxu1 %v1584_v7 }
  0x9e   : > { %1056 = vmatpush1.bf16.msra.mxu0 %v1582_v10  ;;  %773 = vmatmul.mubr.bf16.gmra.mxu1 %v1560_v8 }
  0x9f   : > { %1057 = vmatprep.subr.bf16.mxu0 %v1587_v11 }
  0xa0   : > { %1375 = vmatpush1.bf16.msra.mxu1 %v1582_v10 }
  0xa1   : > { %1360 = vmatprep.subr.bf16.mxu1 %v1587_v11 }
  0xa2   : > { %1058 = vmatpush1.bf16.msra.mxu0 %v1585_v12 }
  0xa3   : > { %1059 = vmatprep.subr.bf16.mxu0 %v1590_v13 }
  0xa4   : > { %1376 = vmatpush1.bf16.msra.mxu1 %v1585_v12 }
  0xa5   : > { %1361 = vmatprep.subr.bf16.mxu1 %v1590_v13 }
  0xa6   : > { %1060 = vmatpush1.bf16.msra.mxu0 %v1588_v14 }
  0xa7   : > { %1061 = vmatprep.subr.bf16.mxu0 %v1593_v15 }
  0xa8   : > { %1377 = vmatpush1.bf16.msra.mxu1 %v1588_v14 }
  0xa9   : > { %1362 = vmatprep.subr.bf16.mxu1 %v1593_v15 }
  0xaa   : > { %1062 = vmatpush1.bf16.msra.mxu0 %v1591_v16 }
  0xab   : > { %1063 = vmatprep.subr.bf16.mxu0 %v1596_v17 }
  0xac   : > { %1378 = vmatpush1.bf16.msra.mxu1 %v1591_v16 }
  0xad   : > { %1363 = vmatprep.subr.bf16.mxu1 %v1596_v17 }
  0xae   : > { %1064 = vmatpush1.bf16.msra.mxu0 %v1594_v18 }
  0xaf   : > { %1065 = vmatprep.subr.bf16.mxu0 %v1599_v19 }
  0xb0   : > { %1379 = vmatpush1.bf16.msra.mxu1 %v1594_v18 }
  0xb1   : > { %1364 = vmatprep.subr.bf16.mxu1 %v1599_v19 }
  0xb2   : > { %1066 = vmatpush1.bf16.msra.mxu0 %v1597_v20 }
  0xb3   : > { %1067 = vmatprep.subr.bf16.mxu0 %v1602_v21 }
  0xb4   : > { %1380 = vmatpush1.bf16.msra.mxu1 %v1597_v20 }
  0xb5   : > { %1365 = vmatprep.subr.bf16.mxu1 %v1602_v21 }
  0xb6   : > { %1068 = vmatpush2.bf16.msra.mxu0 %v1600_v22 }
  0xb7   : > { %1069 = vmatprep.subr.bf16.mxu0 %v1605_v23 }
  0xb8   : > { %1381 = vmatpush2.bf16.msra.mxu1 %v1600_v22 }
  0xb9   : > { %1366 = vmatprep.subr.bf16.mxu1 %v1605_v23 }
  0xba   : > { %1070 = vmatpush2.bf16.msra.mxu0 %v1603_v24 }
  0xbb   : > { %1071 = vmatprep.subr.bf16.mxu0 %v1608_v25 }
  0xbc   : > { %1382 = vmatpush2.bf16.msra.mxu1 %v1603_v24 }
  0xbd   : > { %1367 = vmatprep.subr.bf16.mxu1 %v1608_v25 }
  0xbe   : > { %1072 = vmatpush2.bf16.msra.mxu0 %v1606_v26 }
  0xbf   : > { %1073 = vmatprep.subr.bf16.mxu0 %v1611_v27 }
  0xc0   : > { %1383 = vmatpush2.bf16.msra.mxu1 %v1606_v26 }
  0xc1   : > { %1368 = vmatprep.subr.bf16.mxu1 %v1611_v27 }
  0xc2   : > { %1074 = vmatpush2.bf16.msra.mxu0 %v1609_v28 }
  0xc3   : > { %1075 = vmatprep.subr.bf16.mxu0 %v1614_v29 }
  0xc4   : > { %1384 = vmatpush2.bf16.msra.mxu1 %v1609_v28 }
  0xc5   : > { %1369 = vmatprep.subr.bf16.mxu1 %v1614_v29 }
  0xc6   : > { %1076 = vmatpush2.bf16.msra.mxu0 %v1612_v30 }
  0xc7   : > { %1077 = vmatprep.subr.bf16.mxu0 %v1617_v31 }
  0xc8   : > { %1385 = vmatpush2.bf16.msra.mxu1 %v1612_v30 }
  0xc9   : > { %1370 = vmatprep.subr.bf16.mxu1 %v1617_v31 }
  0xca   : > { %1078 = vmatpush2.bf16.msra.mxu0 %v1615_v32 }
  0xcb   : > { %1079 = vmatprep.subr.bf16.mxu0 %v1620_v33 }
  0xcc   : > { %1386 = vmatpush2.bf16.msra.mxu1 %v1615_v32 }
  0xcd   : > { %1371 = vmatprep.subr.bf16.mxu1 %v1620_v33 }
  0xce   : > { %1080 = vmatpush2.bf16.msra.mxu0 %v1618_v34 }
  0xcf   : > { %1081 = vmatprep.subr.bf16.mxu0 %v1623_v35 }
  0xd0   : > { %1387 = vmatpush2.bf16.msra.mxu1 %v1618_v34 }
  0xd1   : > { %1372 = vmatprep.subr.bf16.mxu1 %v1623_v35 }
  0xd2   : > { %1082 = vmatpush2.bf16.msra.mxu0 %v1621_v36 }
  0xd4   : > { %1388 = vmatpush2.bf16.msra.mxu1 %v1621_v36 }
 0x155   : > { %v711_v37 = vpop.f32.mrf.mxu0  ;;  %v764_v58 = vpop.f32.mrf.mxu1 }
 0x156   : > { %v1311_v38 = vmul.f32 -1.442695, %v711_v37 }
 0x157   : > { %v713_v39 = vpop.f32.mrf.mxu0  ;;  %v766_v63 = vpop.f32.mrf.mxu1 }
 0x158   : > { %1624 = vpow2.f32 %v1311_v38  ;;  %v1312_v40 = vmul.f32 -1.442695, %v713_v39 }
 0x159   : > { %v715_v41 = vpop.f32.mrf.mxu0  ;;  %v768_v4 = vpop.f32.mrf.mxu1 }
 0x15a   : > { %1626 = vpow2.f32 %v1312_v40  ;;  %v1313_v42 = vmul.f32 -1.442695, %v715_v41 }
 0x15b   : > { %v717_v43 = vpop.f32.mrf.mxu0  ;;  %v770_v8 = vpop.f32.mrf.mxu1 }
 0x15c   : > { %1628 = vpow2.f32 %v1313_v42  ;;  %v1314_v44 = vmul.f32 -1.442695, %v717_v43 }
 0x15d   : > { %v2079_v45 = vpop.f32.mrf.mxu0 }
 0x15e   : > { %1630 = vpow2.f32 %v1314_v44  ;;  %v1315_v46 = vmul.f32 -1.442695, %v2079_v45  ;;  %v774_v12 = vpop.f32.mrf.mxu1 }
 0x15f   : > { %v723_v47 = vpop.f32.mrf.mxu0 }
 0x160   : > { %1632 = vpow2.f32 %v1315_v46  ;;  %v1316_v48 = vmul.f32 -1.442695, %v723_v47  ;;  %v776_v19 = vpop.f32.mrf.mxu1 }
 0x161   : > { %v725_v49 = vpop.f32.mrf.mxu0 }
 0x162   : > { %1634 = vpow2.f32 %v1316_v48  ;;  %v1317_v50 = vmul.f32 -1.442695, %v725_v49  ;;  %v778_v28 = vpop.f32.mrf.mxu1 }
 0x163   : > { %v727_v51 = vpop.f32.mrf.mxu0 }
 0x164   : > { %1636 = vpow2.f32 %v1317_v50  ;;  %v1318_v52 = vmul.f32 -1.442695, %v727_v51  ;;  %v780_v35 = vpop.f32.mrf.mxu1 }
 0x165   : > { %v1625_v53 = vpop.eup %1624 }
 0x166   : > { %1638 = vpow2.f32 %v1318_v52  ;;  %v807_v55 = vadd.f32 1.0, %v1625_v53  ;;  %v855_v52 = vld [vmem:[#allocation8 + $0x20] sm:$0xff] }
 0x167   : > { %v1627_v54 = vpop.eup %1626 }
 0x168   : > { %v808_v56 = vadd.f32 1.0, %v1627_v54 }
 0x169   : > { %v1629_v57 = vpop.eup %1628 }
 0x16a   : > { %1640 = vrcp.f32 %v808_v56  ;;  %v809_v59 = vadd.f32 1.0, %v1629_v57 }
 0x16b   : > { %v1631_v60 = vpop.eup %1630  ;;  %1642 = vrcp.f32 %v807_v55  ;;  %v856_v55 = vld [vmem:[#allocation8 + $0x28] sm:$0xff] }
 0x16c   : > { %1644 = vrcp.f32 %v809_v59  ;;  %v810_v61 = vadd.f32 1.0, %v1631_v60 }
 0x16d   : > { %v1633_v62 = vpop.eup %1632 }
 0x16e   : > { %1646 = vrcp.f32 %v810_v61  ;;  %v811_v1 = vadd.f32 1.0, %v1633_v62  ;;  %v858_v61 = vld [vmem:[#allocation8 + $0x38] sm:$0xff] }
 0x16f   : > { %v1635_v0 = vpop.eup %1634 }
 0x170   : > { %v812_v2 = vadd.f32 1.0, %v1635_v0 }
 0x171   : > { %v1637_v3 = vpop.eup %1636 }
 0x172   : > { %1648 = vrcp.f32 %v812_v2  ;;  %v813_v5 = vadd.f32 1.0, %v1637_v3 }
 0x173   : > { %v1639_v6 = vpop.eup %1638  ;;  %1650 = vrcp.f32 %v811_v1 }
 0x174   : > { %1652 = vrcp.f32 %v813_v5  ;;  %v814_v7 = vadd.f32 1.0, %v1639_v6 }
 0x176   : > { %1654 = vrcp.f32 %v814_v7 }
 0x177   : > { %v1641_v9 = vpop.eup %1640 }
 0x178   : > { %v1643_v10 = vpop.eup %1642  ;;  %v832_v13 = vmul.f32 %v1641_v9, %v713_v39 }
 0x179   : > { %v1645_v11 = vpop.eup %1644  ;;  %v831_v16 = vmul.f32 %v1643_v10, %v711_v37 }
 0x17a   : > { %v833_v14 = vmul.f32 %v1645_v11, %v715_v41  ;;  %v840_v20 = vmul.f32 %v832_v13, %v766_v63  ;;  %v851_v41 = vld [vmem:[#allocation8] sm:$0xff] }
 0x17b   : > { %v1647_v15 = vpop.eup %1646  ;;  %v839_v23 = vmul.f32 %v831_v16, %v764_v58  ;;  %v857_v58 = vld [vmem:[#allocation8 + $0x30] sm:$0xff] }
 0x17c   : > { %v834_v17 = vmul.f32 %v1647_v15, %v717_v43  ;;  %v841_v18 = vmul.f32 %v833_v14, %v768_v4  ;;  %v852_v43 = vld [vmem:[#allocation8 + $0x8] sm:$0xff] }
 0x17e   : > { %v842_v21 = vmul.f32 %v834_v17, %v770_v8  ;;  %v847_v27 = vpack.c.bf16 %v841_v18, %v839_v23 }
 0x17f   : > { %v1649_v22 = vpop.eup %1648 }
 0x180   : > { %v1651_v24 = vpop.eup %1650  ;;  %v848_v25 = vpack.c.bf16 %v842_v21, %v840_v20  ;;  %v836_v29 = vmul.f32 %v1649_v22, %v723_v47  ;;  %v853_v47 = vld [vmem:[#allocation8 + $0x10] sm:$0xff] }
 0x181   : > { %v1653_v26 = vpop.eup %1652  ;;  %v835_v32 = vmul.f32 %v1651_v24, %v2079_v45 }
 0x182   : > { %v837_v30 = vmul.f32 %v1653_v26, %v725_v49  ;;  %1083 = vmatprep.mubr.bf16.mxu0 %v848_v25  ;;  %v844_v36 = vmul.f32 %v836_v29, %v776_v19  ;;  %v854_v49 = vld [vmem:[#allocation8 + $0x18] sm:$0xff] }
 0x183   : > { %v1655_v31 = vpop.eup %1654  ;;  %1084 = vmatmul.mubr.bf16.vlgmr.msra.gmra.mxu0 %v847_v27  ;;  %v843_v38 = vmul.f32 %v835_v32, %v774_v12 }
 0x184   : > { %v838_v33 = vmul.f32 %v1655_v31, %v727_v51  ;;  %v845_v34 = vmul.f32 %v837_v30, %v778_v28 }
 0x186   : > { %v846_v37 = vmul.f32 %v838_v33, %v780_v35  ;;  %v849_v40 = vpack.c.bf16 %v845_v34, %v843_v38 }
 0x188   : > { %v850_v39 = vpack.c.bf16 %v846_v37, %v844_v36 }
 0x18a   : > { %1093 = vmatprep.mubr.bf16.mxu1 %v850_v39 }
 0x18b   : > { %1094 = vmatmul.mubr.bf16.vlgmr.msra.gmra.mxu1 %v849_v40 }
 0x243   : > { %v1085_v42 = vpop.f32.mrf.mxu0 }
 0x244   : > { %v1104_v44 = vadd.f32 %v1085_v42, %v851_v41 }
 0x245   : > { %v1087_v46 = vpop.f32.mrf.mxu0 }
 0x246   : > { %1112 = vst [vmem:[#allocation8] sm:$0xff] %v1104_v44  ;;  %v1105_v48 = vadd.f32 %v1087_v46, %v852_v43 }
 0x247   : > { %v1089_v45 = vpop.f32.mrf.mxu0 }
 0x248   : > { %1113 = vst [vmem:[#allocation8 + $0x8] sm:$0xff] %v1105_v48  ;;  %v1106_v50 = vadd.f32 %v1089_v45, %v853_v47 }
 0x249   : > { %v1091_v51 = vpop.f32.mrf.mxu0 }
 0x24a   : > { %1114 = vst [vmem:[#allocation8 + $0x10] sm:$0xff] %v1106_v50  ;;  %v1107_v53 = vadd.f32 %v1091_v51, %v854_v49 }
 0x24b   : > { %v1095_v54 = vpop.f32.mrf.mxu1 }
 0x24c   : > { %1115 = vst [vmem:[#allocation8 + $0x18] sm:$0xff] %v1107_v53  ;;  %v1108_v56 = vadd.f32 %v1095_v54, %v855_v52 }
 0x24d   : > { %v1097_v57 = vpop.f32.mrf.mxu1 }
 0x24e   : > { %1116 = vst [vmem:[#allocation8 + $0x20] sm:$0xff] %v1108_v56  ;;  %v1109_v59 = vadd.f32 %v1097_v57, %v856_v55 }
 0x24f   : > { %v1099_v60 = vpop.f32.mrf.mxu1 }
 0x250   : > { %1117 = vst [vmem:[#allocation8 + $0x28] sm:$0xff] %v1109_v59  ;;  %v1110_v62 = vadd.f32 %v1099_v60, %v857_v58 }
 0x251   : > { %v1101_v63 = vpop.f32.mrf.mxu1 }
 0x252   : > { %1118 = vst [vmem:[#allocation8 + $0x30] sm:$0xff] %v1110_v62  ;;  %v1111_v0 = vadd.f32 %v1101_v63, %v858_v61 }
 0x254   : > { %1119 = vst [vmem:[#allocation8 + $0x38] sm:$0xff] %v1111_v0 }
 0x255   : > { %1751 = shalt.err (!%p1748_p11)
}
 0x256   : > { %s1831_s5 = smov 256   ;;  %s1832_s7 = smov 16  }
 0x257   : > { %1398 = dma.vmem_to_hbm [thread:$0]  (%p1415_p2), %s1131_s23, 1024, %s2116_s3, [#allocation4], %s1831_s5, %s1831_s5, %s1832_s7  }
 0x258   : > { %1795 = dma.done.wait (%p1415_p2), [#allocation4], 1024  }
 0x259   : > { %1797 = vsyncadd (%p1415_p2), [#allocation4], 4294966272 }
 0x25a PF: > { %s18_s17 = sadd.s32 1, %s1820_s17   ;;  %s2121_s12 = smov %s1804_s13 }
 0x25b   : > { %p15_p12 = scmp.ge.s32.totalorder %s18_s17, 4   ;;  %s2122_s13 = smov %s1808_s14 }
 0x25c   : > { %s2123_s14 = smov %s1897_s24  ;;  %s2124_s15 = smov %s1816_s16 }
 0x25d   : > { %s2125_s16 = smov %s2127_s18  ;;  %17 = sbr.rel (!%p15_p12) target bundleno = 6 (0x6), region = 91 }
 0x262   :  { %1146 = vsyncpa [#allocation3], 1 }
 0x263   :  { %1148 = vsyncpa [#allocation3 + $0x1], 1 }
 0x264   :  { %1149 = vsyncpa [#allocation6], 1 }
 0x265   :  { %1151 = vsyncpa [#allocation6 + $0x1], 1 }
 0x266   :  { %1152 = vsyncpa [#allocation4], 1 }
 0x267   :  { %1154 = vsyncpa [#allocation4 + $0x1], 1 }

</bundles_post_ra>
